<compile_context>
chip_gen: v5e
topology: v5e:2x2
jax: 0.10.0
libtpu: 0.0.40
codegen_flags: <defaults>
</compile_context>

<pallas_src>
import functools

import jax
import jax.numpy as jnp
from jax import lax
from jax.experimental import pallas as pl
from jax.experimental.pallas import tpu as pltpu


def gate_kernel(x_ref, w_ref, scale_ref, o_ref, *, num_experts):
    """One token tile of the BitMoE Gate forward.

    x_ref     : VMEM [tm, D]      f32 token tile
    w_ref     : VMEM [D, E_pad]   bf16 ternary weight (exact {-1, 0, +1}, zero-padded)
    scale_ref : VMEM [1, E_pad]   f32 combined weight dequant scale = mean|W|_clamped / 127
    o_ref     : VMEM [tm, E_pad]  f32 softmax probabilities (padded experts ~ 0)
    """
    x = x_ref[...].astype(jnp.float32)                     # [tm, D]
    d = x.shape[-1]

    # --- fused SimpleRMSNorm + per-token absmax int8 quantization -------------
    #   x_norm = x * c,  c = sqrt(D) / ||x||   (per row)
    l2sq = jnp.sum(x * x, axis=-1, keepdims=True)          # [tm, 1]
    c = lax.rsqrt(jnp.maximum(l2sq, 1e-24)) * jnp.sqrt(jnp.float32(d))
    #   absmax of x_norm per row, with activation_quant's 1e-5 clamp
    absmax_n = jnp.maximum(jnp.max(jnp.abs(x), axis=-1, keepdims=True) * c, 1e-5)
    #   integer-valued activations: round(x_norm * 127 / absmax) clipped to int8 range
    q_mult = c * (127.0 / absmax_n)                        # [tm, 1]
    x_int = jnp.clip(jnp.round(x * q_mult), -128.0, 127.0)

    # --- MXU matmul on exact integer-valued bf16 operands ----------------------
    logits = jnp.dot(x_int.astype(jnp.bfloat16), w_ref[...],
                     preferred_element_type=jnp.float32)   # [tm, E_pad]
    # dequant: per-row activation scale (absmax/127) * global weight scale mean|W|
    logits = logits * (absmax_n * scale_ref[...])          # [tm,1]*[1,E_pad] broadcast

    # --- softmax over the real experts (mask lane padding with finite value) ---
    e_pad = logits.shape[-1]
    if num_experts < e_pad:
        col = lax.broadcasted_iota(jnp.int32, logits.shape, 1)
        logits = jnp.where(col < num_experts, logits, jnp.float32(-1e30))
    m = jnp.max(logits, axis=-1, keepdims=True)
    e = jnp.exp(logits - m)                                # padded lanes underflow to 0
    denom = jnp.sum(e, axis=-1, keepdims=True)
    o_ref[...] = (e / denom).astype(o_ref.dtype)


def _round_up(x, m):
    return (x + m - 1) // m * m


def _choose_tm(T, D, E_pad, vmem_budget_bytes=16 * 1024 * 1024, tm_max=512):
    """Largest token tile fitting a conservative VMEM budget.

    Accounts for double-buffered f32 input/output tiles plus a few f32 [tm, D]
    temporaries; tm_max=512 keeps the working set small enough for v7x's 64 MiB
    VMEM while amortizing per-grid-step overhead on v5e/v6e.
    """
    per_row = (2 * D + 2 * E_pad + 4 * D) * 4
    tm = min(tm_max, max(8, vmem_budget_bytes // max(per_row, 1)))
    tm = max(8, (tm // 8) * 8)
    tm = min(tm, _round_up(T, 8))       # never larger than the padded token count
    return tm


def quantize_gate_weight(w, e_pad):
    """BitLinear weight_quant, hoisted out of the kernel (runs once per call).

    Returns:
      w_t        : [D, E_pad] bf16 ternary weight (exact values in {-1, 0, +1},
                   zero-padded expert columns)
      post_scale : [1, E_pad] f32, every entry = clamp(mean|W|, 1e-5) / 127
                   (combined dequant factor applied after the matmul)
    """
    E, D = w.shape
    w32 = w.astype(jnp.float32)
    mean_abs = jnp.maximum(jnp.mean(jnp.abs(w32)), 1e-5)
    w_scale = 1.0 / mean_abs
    w_tern = jnp.clip(jnp.round(w32 * w_scale), -1.0, 1.0)       # {-1, 0, +1}
    w_t = jnp.zeros((D, e_pad), jnp.bfloat16)
    w_t = w_t.at[:, :E].set(w_tern.T.astype(jnp.bfloat16))       # [D, E_pad]
    post_scale = jnp.full((1, e_pad), mean_abs * (1.0 / 127.0), jnp.float32)
    return w_t, post_scale


def gate_forward(x, w, *, tm=None):
    """Gate forward: softmax(BitLinear(x), axis=-1).

    x: [B, S, D] float, w: [E, D] float  ->  [B, S, E] float32.
    """
    B, S, D = x.shape
    E = w.shape[0]
    T = B * S
    E_pad = _round_up(max(E, 128), 128)          # lane-dense output slab

    w_t, post_scale = quantize_gate_weight(w, E_pad)

    if tm is None:
        tm = _choose_tm(T, D, E_pad)
    T_pad = _round_up(T, tm)

    x2 = x.reshape(T, D).astype(jnp.float32)
    if T_pad != T:
        x2 = jnp.pad(x2, ((0, T_pad - T), (0, 0)))  # zero rows are harmless

    kernel = functools.partial(gate_kernel, num_experts=E)

    out = pl.pallas_call(
        kernel,
        out_shape=jax.ShapeDtypeStruct((T_pad, E_pad), jnp.float32),
        grid=(T_pad // tm,),
        in_specs=[
            pl.BlockSpec((tm, D), lambda i: (i, 0)),        # token tile
            pl.BlockSpec((D, E_pad), lambda i: (0, 0)),     # resident ternary weight
            pl.BlockSpec((1, E_pad), lambda i: (0, 0)),     # weight dequant scale row
        ],
        out_specs=pl.BlockSpec((tm, E_pad), lambda i: (i, 0)),
        compiler_params=pltpu.CompilerParams(
            dimension_semantics=("parallel",),     # token tiles are independent
            vmem_limit_bytes=48 * 1024 * 1024,
        ),
    )(x2, w_t, post_scale)

    return out[:T, :E].reshape(B, S, E)


def gate_reference(x, w):
    """Pure-JAX port of the PyTorch Gate forward (for correctness checking)."""
    d = x.shape[-1]
    x32 = x.astype(jnp.float32)
    l2 = jnp.sqrt(jnp.sum(x32 * x32, axis=-1, keepdims=True))
    x_norm = x32 / jnp.maximum(l2, 1e-12) * jnp.sqrt(jnp.float32(d))
    a_scale = 127.0 / jnp.maximum(
        jnp.max(jnp.abs(x_norm), axis=-1, keepdims=True), 1e-5)
    x_q = jnp.clip(jnp.round(x_norm * a_scale), -128.0, 127.0) / a_scale
    w_scale = 1.0 / jnp.maximum(jnp.mean(jnp.abs(w)), 1e-5)
    w_q = jnp.clip(jnp.round(w * w_scale), -1.0, 1.0) / w_scale
    logits = x_q @ w_q.T
    return jax.nn.softmax(logits, axis=-1)


def init_gate_params(key, dim, num_experts):
    # Deterministic synthetic init (Kaiming-uniform-ish like nn.Linear default).
    bound = 1.0 / jnp.sqrt(jnp.float32(dim))
    return jax.random.uniform(
        key, (num_experts, dim), jnp.float32, minval=-bound, maxval=bound)


if __name__ == "__main__":
    batch, seq, dim, num_experts = 2, 8, 32, 8

    key = jax.random.PRNGKey(0)
    kx, kw = jax.random.split(key)
    x = jax.random.normal(kx, (batch, seq, dim), dtype=jnp.float32)
    w = init_gate_params(kw, dim, num_experts)

    probs = gate_forward(x, w)
    jax.block_until_ready(probs)

    # Sanity: shape, softmax rows ~1, and match vs. pure-JAX reference.
    assert probs.shape == (batch, seq, num_experts)
    row_sums = jnp.sum(probs, axis=-1)
    assert bool(jnp.allclose(row_sums, 1.0, atol=1e-3)), row_sums
    ref = gate_reference(x, w)
    assert bool(jnp.allclose(probs, ref, atol=2e-3)), jnp.max(jnp.abs(probs - ref))

    print("KERNEL_OK")
</pallas_src>

<mosaic_0001>
module attributes {stable_mosaic.version = 11 : i64} {
  func.func @gate_kernel(%arg0: i32, %arg1: memref<16x32xf32, #tpu.memory_space<vmem>>, %arg2: memref<32x128xbf16, #tpu.memory_space<vmem>>, %arg3: memref<1x128xf32, #tpu.memory_space<vmem>>, %arg4: memref<16x128xf32, #tpu.memory_space<vmem>>) attributes {dimension_semantics = [#tpu.dimension_semantics<parallel>], iteration_bounds = array<i64: 1>, scalar_prefetch = 0 : i64, scratch_operands = 0 : i64, tpu.core_type = #tpu.core_type<tc>, window_params = [{transform_indices = @transform_0, window_bounds = array<i64: 16, 32>}, {pipeline_mode = #tpu.pipeline_mode<synchronous>, transform_indices = @transform_1, window_bounds = array<i64: 32, 128>}, {pipeline_mode = #tpu.pipeline_mode<synchronous>, transform_indices = @transform_2, window_bounds = array<i64: 1, 128>}, {transform_indices = @transform_3, window_bounds = array<i64: 16, 128>}]} {
    %c0 = arith.constant 0 : index
    %c0_0 = arith.constant 0 : index
    %0 = vector.load %arg1[%c0, %c0_0] : memref<16x32xf32, #tpu.memory_space<vmem>>, vector<16x32xf32>
    %1 = arith.mulf %0, %0 : vector<16x32xf32>
    %cst = arith.constant dense<0.000000e+00> : vector<16xf32>
    %2 = vector.multi_reduction <add>, %1, %cst [1] : vector<16x32xf32> to vector<16xf32>
    %3 = vector.shape_cast %2 : vector<16xf32> to vector<16x1xf32>
    %cst_1 = arith.constant 1.000000e-24 : f32
    %4 = vector.broadcast %cst_1 : f32 to vector<16x1xf32>
    %5 = arith.maximumf %3, %4 : vector<16x1xf32>
    %6 = math.rsqrt %5 : vector<16x1xf32>
    %cst_2 = arith.constant 3.200000e+01 : f32
    %7 = math.sqrt %cst_2 : f32
    %8 = vector.broadcast %7 : f32 to vector<16x1xf32>
    %9 = arith.mulf %6, %8 : vector<16x1xf32>
    %10 = math.absf %0 : vector<16x32xf32>
    %cst_3 = arith.constant dense<0xFF800000> : vector<16xf32>
    %11 = vector.multi_reduction <maximumf>, %10, %cst_3 [1] : vector<16x32xf32> to vector<16xf32>
    %12 = vector.shape_cast %11 : vector<16xf32> to vector<16x1xf32>
    %13 = arith.mulf %12, %9 : vector<16x1xf32>
    %cst_4 = arith.constant 9.99999974E-6 : f32
    %14 = vector.broadcast %cst_4 : f32 to vector<16x1xf32>
    %15 = arith.maximumf %13, %14 : vector<16x1xf32>
    %cst_5 = arith.constant 1.270000e+02 : f32
    %16 = vector.broadcast %cst_5 : f32 to vector<16x1xf32>
    %17 = arith.divf %16, %15 : vector<16x1xf32>
    %18 = arith.mulf %9, %17 : vector<16x1xf32>
    %19 = vector.broadcast %18 : vector<16x1xf32> to vector<16x32xf32>
    %20 = arith.mulf %0, %19 : vector<16x32xf32>
    %21 = math.roundeven %20 : vector<16x32xf32>
    %cst_6 = arith.constant -1.280000e+02 : f32
    %cst_7 = arith.constant 1.270000e+02 : f32
    %22 = vector.broadcast %cst_6 : f32 to vector<16x32xf32>
    %23 = arith.maximumf %22, %21 : vector<16x32xf32>
    %24 = vector.broadcast %cst_7 : f32 to vector<16x32xf32>
    %25 = arith.minimumf %24, %23 : vector<16x32xf32>
    %26 = arith.truncf %25 : vector<16x32xf32> to vector<16x32xbf16>
    %c0_8 = arith.constant 0 : index
    %c0_9 = arith.constant 0 : index
    %27 = vector.load %arg2[%c0_8, %c0_9] : memref<32x128xbf16, #tpu.memory_space<vmem>>, vector<32x128xbf16>
    %cst_10 = arith.constant dense<0.000000e+00> : vector<16x128xf32>
    %28 = tpu.matmul %26, %27, %cst_10 {dimension_numbers = #tpu.dot_dimension_numbers<[1], [0], [0], [1], [0, 0, 1, 1], [], []>} : vector<16x32xbf16>, vector<32x128xbf16>, vector<16x128xf32> -> vector<16x128xf32>
    %c0_11 = arith.constant 0 : index
    %c0_12 = arith.constant 0 : index
    %29 = vector.load %arg3[%c0_11, %c0_12] : memref<1x128xf32, #tpu.memory_space<vmem>>, vector<1x128xf32>
    %30 = vector.broadcast %15 : vector<16x1xf32> to vector<16x128xf32>
    %31 = vector.broadcast %29 : vector<1x128xf32> to vector<16x128xf32>
    %32 = arith.mulf %30, %31 : vector<16x128xf32>
    %33 = arith.mulf %28, %32 : vector<16x128xf32>
    %34 = tpu.iota {dimensions = array<i32: 1>} : vector<16x128xi32>
    %c8_i32 = arith.constant 8 : i32
    %35 = vector.broadcast %c8_i32 : i32 to vector<16x128xi32>
    %36 = arith.cmpi slt, %34, %35 : vector<16x128xi32>
    %cst_13 = arith.constant -1.000000e+30 : f32
    %37 = vector.broadcast %cst_13 : f32 to vector<16x128xf32>
    %38 = arith.select %36, %33, %37 : vector<16x128xi1>, vector<16x128xf32>
    %cst_14 = arith.constant dense<0xFF800000> : vector<16xf32>
    %39 = vector.multi_reduction <maximumf>, %38, %cst_14 [1] : vector<16x128xf32> to vector<16xf32>
    %40 = vector.shape_cast %39 : vector<16xf32> to vector<16x1xf32>
    %41 = vector.broadcast %40 : vector<16x1xf32> to vector<16x128xf32>
    %42 = arith.subf %38, %41 : vector<16x128xf32>
    %43 = math.exp %42 : vector<16x128xf32>
    %cst_15 = arith.constant dense<0.000000e+00> : vector<16xf32>
    %44 = vector.multi_reduction <add>, %43, %cst_15 [1] : vector<16x128xf32> to vector<16xf32>
    %45 = vector.shape_cast %44 : vector<16xf32> to vector<16x1xf32>
    %46 = vector.broadcast %45 : vector<16x1xf32> to vector<16x128xf32>
    %47 = arith.divf %43, %46 : vector<16x128xf32>
    %c0_16 = arith.constant 0 : index
    %c0_17 = arith.constant 0 : index
    %48 = vector.load %arg4[%c0_16, %c0_17] : memref<16x128xf32, #tpu.memory_space<vmem>>, vector<16x128xf32>
    tpu.vector_store %arg4[%c0_16, %c0_17], %47 {strides = array<i32>} : memref<16x128xf32, #tpu.memory_space<vmem>>, vector<16x128xf32>,
    return
  }
  func.func @transform_0(%arg0: i32) -> (i32, i32) {
    %c0_i32 = arith.constant 0 : i32
    %c0_i32_0 = arith.constant 0 : i32
    return %arg0, %c0_i32 : i32, i32
  }
  func.func @transform_1(%arg0: i32) -> (i32, i32) {
    %c0_i32 = arith.constant 0 : i32
    %c0_i32_0 = arith.constant 0 : i32
    %c0_i32_1 = arith.constant 0 : i32
    return %c0_i32, %c0_i32_0 : i32, i32
  }
  func.func @transform_2(%arg0: i32) -> (i32, i32) {
    %c0_i32 = arith.constant 0 : i32
    %c0_i32_0 = arith.constant 0 : i32
    %c0_i32_1 = arith.constant 0 : i32
    return %c0_i32, %c0_i32_0 : i32, i32
  }
  func.func @transform_3(%arg0: i32) -> (i32, i32) {
    %c0_i32 = arith.constant 0 : i32
    %c0_i32_0 = arith.constant 0 : i32
    return %arg0, %c0_i32 : i32, i32
  }
}

</mosaic_0001>

<bundles_post_ra>
// kernel: tpu_custom_call.1
= control target key start
LH: loop header
LB: loop body
LE: loop exit
PB: predicated region body
PF: predicated region fallthrough
CT: control target
= control target key end

     0   :  { %8 = vsyncpa [#allocation3], 0  ;;  %s455_s0 = inlined_call_operand.hbm [shape: f32[16,32], index: 0, kind: input, shape index: {}]   ;;  %s456_s1 = inlined_call_operand.hbm [shape: bf16[32,128], index: 1, kind: input, shape index: {}]   ;;  %s457_s2 = inlined_call_operand.vmem [shape: f32[1,128], index: 2, kind: input, shape index: {}]   ;;  %s458_s3 = inlined_call_operand.hbm [shape: f32[16,128], index: 3, kind: output, shape index: {}]  }
   0x1   :  { %9 = vsyncpa [#allocation6], 0 }
   0x2   :  { %10 = vsyncpa [#allocation4], 0  ;;  %s15_s14 = sshll.u32 %s455_s0, 4  ;;  %s377_s15 = smov [#allocation2]   ;;  %s16_s14 = int_to_ptr.hbm [resolvable:$true] %s15_s14 }
   0x3   :  { %s17_s16 = sshll.u32 %s377_s15, 4  ;;  %s28_s19 = sshll.u32 %s456_s1, 4  ;;  %s18_s16 = int_to_ptr.vmem [resolvable:$true] %s17_s16  ;;  %s29_s19 = int_to_ptr.hbm [resolvable:$true] %s28_s19 }
   0x4   :  { %s378_s20 = smov 128   ;;  %s379_s21 = smov 8  }
   0x5   :  { %23 = dma.hbm_to_vmem [thread:$0]  %s16_s14, 256, %s18_s16, [#allocation3], %s378_s20, %s378_s20, %s379_s21  }
   0x6   :  { %s380_s22 = smov [#allocation5]   ;;  %s381_s24 = smov 64  }
   0x7   :  { %s30_s23 = sshll.u32 %s380_s22, 4  ;;  %s382_s0 = smov 4   ;;  %s31_s23 = int_to_ptr.vmem [resolvable:$true] %s30_s23 }
   0x8   :  { %36 = dma.hbm_to_vmem [thread:$0]  %s29_s19, 256, %s31_s23, [#allocation6], %s381_s24, %s381_s24, %s382_s0  }
   0x9   :  { %371 = dma.done.wait [#allocation3], 256  }
   0xa   :  { %372 = vsyncadd [#allocation3], 4294967040 }
   0xb   :  { %373 = dma.done.wait [#allocation6], 256  }
   0xc   :  { %374 = vsyncadd [#allocation6], 4294967040  ;;  %v413_v0 = vld [vmem:[#allocation2] sm:$0xff]  ;;  %vm52_vm0 = vcmask 261120   ;;  %v418_v3 = vld [vmem:[#allocation2 + $0x8] sm:$0xff]  ;;  %s234_s29 = sshll.u32 %s458_s3, 4  ;;  %s235_s29 = int_to_ptr.hbm [resolvable:$true] %s234_s29 }
   0xd   :  { %v50_v1 = vmul.f32 %v413_v0, %v413_v0  ;;  %v83_v2 = vand.u32 2147483647, %v413_v0  ;;  %v51_v6 = vmul.f32 %v418_v3, %v418_v3  ;;  %v84_v7 = vand.u32 2147483647, %v418_v3  ;;  %v258_v29 = vld [vmem:[#allocation5 + $0x8] sm:$0xff]  ;;  %v257_v32 = vld [vmem:[#allocation5] sm:$0xff] }
   0xe   :  { %161 = vmatpush.bf16.msra.mxu0 %v258_v29 }
   0xf   :  { %v53_v4 = vsel %vm52_vm0, %v50_v1, 0.0  ;;  %v85_v5 = vsel %vm52_vm0, %v83_v2, -inf  ;;  %v56_v8 = vsel %vm52_vm0, %v51_v6, 0.0  ;;  %v88_v9 = vsel %vm52_vm0, %v84_v7, -inf }
  0x10   :  { %54 = vadd.xlane.f32.xlu0 %v53_v4  ;;  %86 = vmax.xlane.f32.xlu1 %v85_v5 }
  0x12   :  { %162 = vmatpush.bf16.msra.mxu0 %v257_v32 }
  0x18   :  { %57 = vadd.xlane.f32.xlu0 %v56_v8  ;;  %89 = vmax.xlane.f32.xlu1 %v88_v9 }
  0x83   :  { %v55_v10 = vpop.xlane.xlu0 %54  ;;  %v87_v21 = vpop.xlane.xlu1 %86 }
  0x84   :  { %v59_v11 = vmax.f32 %v55_v10, 1e-24 }
  0x86   :  { %283 = vrsqrt.f32 %v59_v11  ;;  %vm67_vm2 = vweird.f32 %v59_v11 }
  0x8b   :  { %v58_v12 = vpop.xlane.xlu0 %57  ;;  %v90_v33 = vpop.xlane.xlu1 %89 }
  0x8c   :  { %v284_v13 = vpop.eup %283  ;;  %v60_v14 = vmax.f32 %v58_v12, 1e-24 }
  0x8d   :  { %v62_v15 = vmul.f32 %v284_v13, %v59_v11  ;;  %vm68_vm1 = vweird.f32 %v284_v13 }
  0x8e   :  { %285 = vrsqrt.f32 %v60_v14  ;;  %vm69_vm3 = vmor %vm67_vm2, %vm68_vm1  ;;  %vm77_vm5 = vweird.f32 %v60_v14 }
  0x8f   :  { %v63_v16 = vmul.f32 %v284_v13, %v62_v15 }
  0x91   :  { %v64_v17 = vmul.f32 0.5, %v63_v16 }
  0x93   :  { %v65_v18 = vsub.f32 1.5, %v64_v17 }
  0x94   :  { %v286_v19 = vpop.eup %285 }
  0x95   :  { %v72_v20 = vmul.f32 %v286_v19, %v60_v14  ;;  %v66_v22 = vmul.f32 %v284_v13, %v65_v18  ;;  %vm78_vm4 = vweird.f32 %v286_v19 }
  0x96   :  { %vm79_vm6 = vmor %vm77_vm5, %vm78_vm4 }
  0x97   :  { %v73_v23 = vmul.f32 %v286_v19, %v72_v20  ;;  %v70_v24 = vsel %vm69_vm3, %v284_v13, %v66_v22  ;;  %v282_v20 = vld [vmem:[%s457_s2] ss:$0 sm:$0xff]  ;;  %s383_s2 = smov [#allocation7]  }
  0x98   :  { %v81_v25 = vmul.f32 5.656854, %v70_v24  ;;  %s232_s26 = sshll.u32 %s383_s2, 4  ;;  %s233_s26 = int_to_ptr.vmem [resolvable:$true] %s232_s26 }
  0x99   :  { %v74_v26 = vmul.f32 0.5, %v73_v23 }
  0x9a   :  { %v91_v27 = vmul.f32 %v87_v21, %v81_v25 }
  0x9b   :  { %v75_v28 = vsub.f32 1.5, %v74_v26 }
  0x9c   :  { %v427_v30 = vmax.f32 %v91_v27, 1e-05 }
  0x9d   :  { %v76_v31 = vmul.f32 %v286_v19, %v75_v28 }
  0x9e   :  { %287 = vrcp.f32 %v427_v30  ;;  %v106_v41 = vand.u32 2147483648, %v427_v30  ;;  %v104_v43 = vand.u32 2147483647, %v427_v30  ;;  %vm100_vm8 = vweird.f32 %v427_v30 }
  0x9f   :  { %v80_v34 = vsel %vm79_vm6, %v286_v19, %v76_v31  ;;  %v173_v22 = vmul.f32 %v282_v20, %v427_v30 }
  0xa0   :  { %v82_v35 = vmul.f32 5.656854, %v80_v34  ;;  %v107_v46 = vor.u32 1.1754944e-38, %v106_v41  ;;  %vm105_vm10 = vcmp.eq.f32.partialorder %v104_v43, 8.507059e+37 }
  0xa2   :  { %v92_v36 = vmul.f32 %v90_v33, %v82_v35 }
  0xa4   :  { %v288_v37 = vpop.eup %287  ;;  %v430_v38 = vmax.f32 %v92_v36, 1e-05 }
  0xa5   :  { %v96_v39 = vmul.f32 %v288_v37, %v427_v30  ;;  %vm101_vm7 = vweird.f32 %v288_v37 }
  0xa6   :  { %289 = vrcp.f32 %v430_v38  ;;  %vm102_vm9 = vmor %vm100_vm8, %vm101_vm7  ;;  %v121_v52 = vand.u32 2147483648, %v430_v38  ;;  %v119_v55 = vand.u32 2147483647, %v430_v38  ;;  %vm115_vm12 = vweird.f32 %v430_v38 }
  0xa7   :  { %v97_v40 = vsub.f32 1.0, %v96_v39  ;;  %v174_v26 = vmul.f32 %v282_v20, %v430_v38 }
  0xa8   :  { %v122_v58 = vor.u32 1.1754944e-38, %v121_v52  ;;  %vm120_vm14 = vcmp.eq.f32.partialorder %v119_v55, 8.507059e+37 }
  0xa9   :  { %v98_v42 = vmul.f32 %v288_v37, %v97_v40 }
  0xab   :  { %v99_v44 = vadd.f32 %v288_v37, %v98_v42 }
  0xac   :  { %v290_v45 = vpop.eup %289 }
  0xad   :  { %v103_v47 = vsel %vm102_vm9, %v288_v37, %v99_v44  ;;  %v111_v48 = vmul.f32 %v290_v45, %v430_v38  ;;  %vm116_vm11 = vweird.f32 %v290_v45 }
  0xae   :  { %v108_v49 = vsel %vm105_vm10, %v107_v46, %v103_v47  ;;  %vm117_vm13 = vmor %vm115_vm12, %vm116_vm11 }
  0xaf   :  { %v109_v50 = vmul.f32 127.0, %v108_v49  ;;  %v112_v51 = vsub.f32 1.0, %v111_v48 }
  0xb1   :  { %v125_v53 = vmul.f32 %v109_v50, %v81_v25  ;;  %v113_v54 = vmul.f32 %v290_v45, %v112_v51 }
  0xb3   :  { %v127_v56 = vmul.f32 %v125_v53, %v413_v0  ;;  %v114_v57 = vadd.f32 %v290_v45, %v113_v54 }
  0xb5   :  { %v118_v59 = vsel %vm117_vm13, %v290_v45, %v114_v57  ;;  %v261_v60 = vcvt.f32.s32 %v127_v56  ;;  %v264_v5 = vand.u32 2147483648, %v127_v56  ;;  %v259_v6 = vand.u32 2147483647, %v127_v56 }
  0xb6   :  { %v123_v61 = vsel %vm120_vm14, %v122_v58, %v118_v59 }
  0xb7   :  { %v124_v62 = vmul.f32 127.0, %v123_v61  ;;  %v262_v63 = vcvt.s32.f32 %v261_v60  ;;  %vm260_vm15 = vcmp.lt.f32.partialorder %v259_v6, 8388608.0 }
  0xb9   :  { %v126_v1 = vmul.f32 %v124_v62, %v82_v35  ;;  %v263_v2 = vand.u32 2147483647, %v262_v63 }
  0xbb   :  { %v128_v4 = vmul.f32 %v126_v1, %v418_v3  ;;  %v265_v7 = vor.u32 %v264_v5, %v263_v2  ;;  %v177_v3 = vlaneseq }
  0xbd   :  { %v269_v8 = vcvt.f32.s32 %v128_v4  ;;  %v267_v9 = vand.u32 2147483647, %v128_v4  ;;  %v266_v10 = vsel %vm260_vm15, %v265_v7, %v127_v56  ;;  %v272_v12 = vand.u32 2147483648, %v128_v4 }
  0xbe   :  { %v131_v14 = vmax.f32 %v266_v10, -128.0  ;;  %v178_v21 = vand.u32 127, %v177_v3 }
  0xbf   :  { %v270_v0 = vcvt.s32.f32 %v269_v8  ;;  %vm268_vm1 = vcmp.lt.f32.partialorder %v267_v9, 8388608.0 }
  0xc0   :  { %v133_v17 = vmin.f32 %v131_v14, 127.0  ;;  %vm179_vm2 = vcmp.lt.s32.totalorder %v178_v21, 8 }
  0xc1   :  { %v271_v11 = vand.u32 2147483647, %v270_v0 }
  0xc3   :  { %v273_v13 = vor.u32 %v272_v12, %v271_v11 }
  0xc5   :  { %v274_v15 = vsel %vm268_vm1, %v273_v13, %v128_v4 }
  0xc6   :  { %v132_v16 = vmax.f32 %v274_v15, -128.0 }
  0xc8   :  { %v134_v18 = vmin.f32 %v132_v16, 127.0 }
  0xca   :  { %v135_v19 = vpack.c.bf16 %v134_v18, %v133_v17 }
  0xcc   :  { %256 = vmatmul.msk.bf16.vlgmr.msra.gmra.mxu0 %vm52_vm0, %v135_v19 }
 0x149   :  { %v164_v23 = vpop.f32.mrf.mxu0 }
 0x14a   :  { %v175_v24 = vmul.f32 %v173_v22, %v164_v23 }
 0x14c   :  { %v180_v25 = vsel %vm179_vm2, %v175_v24, -1e+30 }
 0x14d   :  { %182 = vmax.xlane.f32.xlu2 %v180_v25 }
 0x151   :  { %v166_v27 = vpop.f32.mrf.mxu0 }
 0x152   :  { %v176_v28 = vmul.f32 %v174_v26, %v166_v27 }
 0x154   :  { %v181_v29 = vsel %vm179_vm2, %v176_v28, -1e+30 }
 0x155   :  { %184 = vmax.xlane.f32.xlu2 %v181_v29 }
 0x1c0   :  { %v183_v31 = vpop.xlane.xlu2 %182 }
 0x1c1   :  { %v186_v32 = vsub.f32 %v180_v25, %v183_v31 }
 0x1c3   :  { %v188_v33 = vmul.f32 1.442695, %v186_v32 }
 0x1c5   :  { %291 = vpow2.f32 %v188_v33 }
 0x1c8   :  { %v185_v34 = vpop.xlane.xlu2 %184 }
 0x1c9   :  { %v187_v35 = vsub.f32 %v181_v29, %v185_v34 }
 0x1cb   :  { %v292_v36 = vpop.eup %291  ;;  %v190_v37 = vmul.f32 1.442695, %v187_v35 }
 0x1cc   :  { %192 = vadd.xlane.f32.xlu0 %v292_v36 }
 0x1cd   :  { %293 = vpow2.f32 %v190_v37 }
 0x1d3   :  { %v294_v30 = vpop.eup %293 }
 0x1d4   :  { %194 = vadd.xlane.f32.xlu1 %v294_v30 }
 0x23f   :  { %v193_v39 = vpop.xlane.xlu0 %192 }
 0x240   :  { %295 = vrcp.f32 %v193_v39  ;;  %v207_v43 = vand.u32 2147483648, %v193_v39  ;;  %v205_v45 = vand.u32 2147483647, %v193_v39  ;;  %vm201_vm3 = vweird.f32 %v193_v39 }
 0x242   :  { %v208_v48 = vor.u32 1.1754944e-38, %v207_v43  ;;  %vm206_vm5 = vcmp.eq.f32.partialorder %v205_v45, 8.507059e+37 }
 0x246   :  { %v296_v40 = vpop.eup %295 }
 0x247   :  { %v197_v38 = vmul.f32 %v296_v40, %v193_v39  ;;  %v195_v41 = vpop.xlane.xlu1 %194  ;;  %vm202_vm0 = vweird.f32 %v296_v40 }
 0x248   :  { %297 = vrcp.f32 %v195_v41  ;;  %vm203_vm4 = vmor %vm201_vm3, %vm202_vm0  ;;  %v222_v54 = vand.u32 2147483648, %v195_v41  ;;  %v220_v56 = vand.u32 2147483647, %v195_v41  ;;  %vm216_vm7 = vweird.f32 %v195_v41 }
 0x249   :  { %v198_v42 = vsub.f32 1.0, %v197_v38 }
 0x24a   :  { %v223_v58 = vor.u32 1.1754944e-38, %v222_v54  ;;  %vm221_vm9 = vcmp.eq.f32.partialorder %v220_v56, 8.507059e+37 }
 0x24b   :  { %v199_v44 = vmul.f32 %v296_v40, %v198_v42 }
 0x24d   :  { %v200_v46 = vadd.f32 %v296_v40, %v199_v44 }
 0x24e   :  { %v298_v47 = vpop.eup %297 }
 0x24f   :  { %v204_v49 = vsel %vm203_vm4, %v296_v40, %v200_v46  ;;  %v212_v50 = vmul.f32 %v298_v47, %v195_v41  ;;  %vm217_vm6 = vweird.f32 %v298_v47 }
 0x250   :  { %v209_v51 = vsel %vm206_vm5, %v208_v48, %v204_v49  ;;  %vm218_vm8 = vmor %vm216_vm7, %vm217_vm6 }
 0x251   :  { %v213_v52 = vsub.f32 1.0, %v212_v50  ;;  %v210_v53 = vmul.f32 %v292_v36, %v209_v51 }
 0x253   :  { %v214_v55 = vmul.f32 %v298_v47, %v213_v52  ;;  %226 = vst [vmem:[#allocation7] sm:$0xff] %v210_v53 }
 0x255   :  { %v215_v57 = vadd.f32 %v298_v47, %v214_v55 }
 0x257   :  { %v219_v59 = vsel %vm218_vm8, %v298_v47, %v215_v57 }
 0x258   :  { %v224_v60 = vsel %vm221_vm9, %v223_v58, %v219_v59 }
 0x259   :  { %v225_v61 = vmul.f32 %v294_v30, %v224_v60 }
 0x25b   :  { %227 = vst [vmem:[#allocation7 + $0x8] sm:$0xff] %v225_v61 }
 0x25c   :  { %240 = dma.vmem_to_hbm [thread:$0]  %s233_s26, 256, %s235_s29, [#allocation4], %s378_s20, %s378_s20, %s379_s21  }
 0x25d   :  { %375 = dma.done.wait [#allocation4], 256  }
 0x25e   :  { %376 = vsyncadd [#allocation4], 4294967040 }
 0x25f   :  { %245 = vsyncpa [#allocation3], 1 }
 0x260   :  { %246 = vsyncpa [#allocation6], 1 }
 0x261   :  { %247 = vsyncpa [#allocation4], 1 }

</bundles_post_ra>
